<compile_context>
chip_gen: v7x
topology: tpu7x:2x2x1
jax: 0.10.0
libtpu: 0.0.40
codegen_flags: <defaults>
</compile_context>

<pallas_src>
import jax
import jax.numpy as jnp
from jax.experimental import pallas as pl
from jax.experimental.pallas import tpu as pltpu


def _round_up(x, m):
    return ((x + m - 1) // m) * m


def _actor_kernel(obs_ref,
                  w0_ref, b0_ref,
                  w1_ref, b1_ref,
                  w2_ref, b2_ref,
                  scale_ref, shift_ref,
                  out_ref):
    # obs tile: [obs_dim, TN]  (features on sublanes, batch on lanes), f32
    x = obs_ref[...]

    # hidden layer 0: Linear + ReLU                [h0_dim, TN]
    h0 = jnp.dot(w0_ref[...], x, preferred_element_type=jnp.float32) + b0_ref[...]
    h0 = jnp.maximum(h0, 0.0)

    # hidden layer 1: Linear + ReLU                [h1_dim, TN]
    h1 = jnp.dot(w1_ref[...], h0, preferred_element_type=jnp.float32) + b1_ref[...]
    h1 = jnp.maximum(h1, 0.0)

    # output layer: Linear + Tanh (tanh on EUP)    [act_dim, TN]
    y = jnp.tanh(jnp.dot(w2_ref[...], h1, preferred_element_type=jnp.float32)
                 + b2_ref[...])

    # rescale (-1, 1) -> (act_min, act_max) as a single fused multiply-add
    out_ref[...] = y * scale_ref[...] + shift_ref[...]


def mlp_actor_forward(obs, params, act_min, act_max, *, tn=8192):
    """Forward pass of MLPActor.

    obs:      [B, obs_dim] float32
    params:   list of (W, b) in PyTorch layout: W [out, in], b [out]
    act_min:  [act_dim]
    act_max:  [act_dim]
    returns:  [B, act_dim] float32
    """
    B, obs_dim = obs.shape
    (w0, b0), (w1, b1), (w2, b2) = params
    act_dim = w2.shape[0]

    # Fold (-1,1)->(act_min,act_max) into one FMA: y*scale + shift.
    act_min = jnp.asarray(act_min, jnp.float32).reshape(act_dim, 1)
    act_max = jnp.asarray(act_max, jnp.float32).reshape(act_dim, 1)
    scale = 0.5 * (act_max - act_min)                      # [act_dim, 1]
    shift = scale + act_min                                # [act_dim, 1]

    # Column-vector biases broadcast along the lane (batch) axis inside the kernel.
    b0c = b0.reshape(-1, 1).astype(jnp.float32)
    b1c = b1.reshape(-1, 1).astype(jnp.float32)
    b2c = b2.reshape(-1, 1).astype(jnp.float32)
    w0 = w0.astype(jnp.float32)
    w1 = w1.astype(jnp.float32)
    w2 = w2.astype(jnp.float32)

    # Lane-dense layout: batch on lanes.
    obs_t = obs.astype(jnp.float32).T                      # [obs_dim, B]

    # Batch tile (lanes).  Big tiles to amortize per-step overhead; keep the
    # grid >= 2 when the batch is large enough so both v7x TensorCores work.
    if B <= 128:
        TN = B                                             # single full-dim tile
    else:
        TN = min(tn, _round_up(B, 128))
        TN = min(TN, _round_up(pl.cdiv(B, 2), 128))        # >= 2 grid steps
    grid = (pl.cdiv(B, TN),)

    def resident(shape):
        # Same block every grid step -> stays VMEM-resident across iterations.
        return pl.BlockSpec(shape, lambda i: (0, 0))

    flops = 2 * B * (w0.shape[0] * w0.shape[1]
                     + w1.shape[0] * w1.shape[1]
                     + w2.shape[0] * w2.shape[1])
    bytes_accessed = 4 * (obs_t.size + B * act_dim
                          + w0.size + w1.size + w2.size
                          + b0c.size + b1c.size + b2c.size
                          + scale.size + shift.size)

    out_t = pl.pallas_call(
        _actor_kernel,
        out_shape=jax.ShapeDtypeStruct((act_dim, B), jnp.float32),
        grid=grid,
        in_specs=[
            pl.BlockSpec((obs_dim, TN), lambda i: (0, i)),   # streamed obs tile
            resident(w0.shape), resident(b0c.shape),
            resident(w1.shape), resident(b1c.shape),
            resident(w2.shape), resident(b2c.shape),
            resident(scale.shape), resident(shift.shape),
        ],
        out_specs=pl.BlockSpec((act_dim, TN), lambda i: (0, i)),
        compiler_params=pltpu.CompilerParams(
            dimension_semantics=("parallel",)),              # shard batch across TCs
        cost_estimate=pl.CostEstimate(
            flops=flops,
            transcendentals=B * act_dim,
            bytes_accessed=bytes_accessed),
    )(obs_t, w0, b0c, w1, b1c, w2, b2c, scale, shift)

    return out_t.T                                           # [B, act_dim]


def _torch_linear_init(key, fan_in, fan_out):
    """torch.nn.Linear default init U(-1/sqrt(fan_in), 1/sqrt(fan_in)), PyTorch layout."""
    kw, kb = jax.random.split(key)
    bound = 1.0 / (float(fan_in) ** 0.5)
    w = jax.random.uniform(kw, (fan_out, fan_in), jnp.float32, -bound, bound)
    b = jax.random.uniform(kb, (fan_out,), jnp.float32, -bound, bound)
    return w, b


def _reference_forward(obs, params, act_min, act_max):
    """Pure-JAX reference, mirrors the PyTorch module exactly (all f32)."""
    (w0, b0), (w1, b1), (w2, b2) = params
    h = jnp.maximum(obs @ w0.T + b0, 0.0)
    h = jnp.maximum(h @ w1.T + b1, 0.0)
    y = jnp.tanh(h @ w2.T + b2)
    return (y + 1.0) / 2.0 * (act_max - act_min) + act_min


if __name__ == "__main__":
    # Small shapes consistent with the module: obs_dim=8, hidden_sizes=(32, 32), act_dim=4.
    B, obs_dim, h0_dim, h1_dim, act_dim = 2, 8, 32, 32, 4

    key = jax.random.PRNGKey(0)
    k_obs, k_l0, k_l1, k_l2, k_big = jax.random.split(key, 5)

    obs = jax.random.normal(k_obs, (B, obs_dim), jnp.float32)

    params = [
        _torch_linear_init(k_l0, obs_dim, h0_dim),
        _torch_linear_init(k_l1, h0_dim, h1_dim),
        _torch_linear_init(k_l2, h1_dim, act_dim),
    ]

    # Per-dimension action bounds.
    act_min = jnp.full((act_dim,), -2.0, jnp.float32)
    act_max = jnp.full((act_dim,), 2.0, jnp.float32)

    out = jax.block_until_ready(mlp_actor_forward(obs, params, act_min, act_max))
    ref = _reference_forward(obs, params, act_min, act_max)
    assert out.shape == (B, act_dim)
    assert jnp.allclose(out, ref, atol=1e-3, rtol=1e-3), "Pallas output mismatch (small batch)"

    # Secondary check: exercise the batch grid (multiple tiles + partial edge tile).
    B2 = 1037
    obs2 = jax.random.normal(k_big, (B2, obs_dim), jnp.float32)
    out2 = jax.block_until_ready(mlp_actor_forward(obs2, params, act_min, act_max, tn=512))
    ref2 = _reference_forward(obs2, params, act_min, act_max)
    assert out2.shape == (B2, act_dim)
    assert jnp.allclose(out2, ref2, atol=1e-3, rtol=1e-3), "Pallas output mismatch (batch grid)"

    print("KERNEL_OK")
</pallas_src>

<mosaic_0001>
module attributes {stable_mosaic.version = 11 : i64} {
  func.func @_actor_kernel(%arg0: i32, %arg1: memref<8x2xf32, #tpu.memory_space<vmem>>, %arg2: memref<32x8xf32, #tpu.memory_space<vmem>>, %arg3: memref<32x1xf32, #tpu.memory_space<vmem>>, %arg4: memref<32x32xf32, #tpu.memory_space<vmem>>, %arg5: memref<32x1xf32, #tpu.memory_space<vmem>>, %arg6: memref<4x32xf32, #tpu.memory_space<vmem>>, %arg7: memref<4x1xf32, #tpu.memory_space<vmem>>, %arg8: memref<4x1xf32, #tpu.memory_space<vmem>>, %arg9: memref<4x1xf32, #tpu.memory_space<vmem>>, %arg10: memref<4x2xf32, #tpu.memory_space<vmem>>) attributes {dimension_semantics = [#tpu.dimension_semantics<parallel>], iteration_bounds = array<i64: 1>, scalar_prefetch = 0 : i64, scratch_operands = 0 : i64, tpu.core_type = #tpu.core_type<tc>, window_params = [{transform_indices = @transform_0, window_bounds = array<i64: 8, 2>}, {pipeline_mode = #tpu.pipeline_mode<synchronous>, transform_indices = @transform_1, window_bounds = array<i64: 32, 8>}, {pipeline_mode = #tpu.pipeline_mode<synchronous>, transform_indices = @transform_2, window_bounds = array<i64: 32, 1>}, {pipeline_mode = #tpu.pipeline_mode<synchronous>, transform_indices = @transform_3, window_bounds = array<i64: 32, 32>}, {pipeline_mode = #tpu.pipeline_mode<synchronous>, transform_indices = @transform_4, window_bounds = array<i64: 32, 1>}, {pipeline_mode = #tpu.pipeline_mode<synchronous>, transform_indices = @transform_5, window_bounds = array<i64: 4, 32>}, {pipeline_mode = #tpu.pipeline_mode<synchronous>, transform_indices = @transform_6, window_bounds = array<i64: 4, 1>}, {pipeline_mode = #tpu.pipeline_mode<synchronous>, transform_indices = @transform_7, window_bounds = array<i64: 4, 1>}, {pipeline_mode = #tpu.pipeline_mode<synchronous>, transform_indices = @transform_8, window_bounds = array<i64: 4, 1>}, {transform_indices = @transform_9, window_bounds = array<i64: 4, 2>}]} {
    %c0 = arith.constant 0 : index
    %c0_0 = arith.constant 0 : index
    %0 = vector.load %arg1[%c0, %c0_0] : memref<8x2xf32, #tpu.memory_space<vmem>>, vector<8x2xf32>
    %c0_1 = arith.constant 0 : index
    %c0_2 = arith.constant 0 : index
    %1 = vector.load %arg2[%c0_1, %c0_2] : memref<32x8xf32, #tpu.memory_space<vmem>>, vector<32x8xf32>
    %cst = arith.constant dense<0.000000e+00> : vector<32x2xf32>
    %2 = tpu.matmul %1, %0, %cst {dimension_numbers = #tpu.dot_dimension_numbers<[1], [0], [0], [1], [0, 0, 1, 1], [], []>} : vector<32x8xf32>, vector<8x2xf32>, vector<32x2xf32> -> vector<32x2xf32>
    %c0_3 = arith.constant 0 : index
    %c0_4 = arith.constant 0 : index
    %3 = vector.load %arg3[%c0_3, %c0_4] : memref<32x1xf32, #tpu.memory_space<vmem>>, vector<32x1xf32>
    %4 = vector.broadcast %3 : vector<32x1xf32> to vector<32x2xf32>
    %5 = arith.addf %2, %4 : vector<32x2xf32>
    %cst_5 = arith.constant 0.000000e+00 : f32
    %6 = vector.broadcast %cst_5 : f32 to vector<32x2xf32>
    %7 = arith.maximumf %5, %6 : vector<32x2xf32>
    %c0_6 = arith.constant 0 : index
    %c0_7 = arith.constant 0 : index
    %8 = vector.load %arg4[%c0_6, %c0_7] : memref<32x32xf32, #tpu.memory_space<vmem>>, vector<32x32xf32>
    %cst_8 = arith.constant dense<0.000000e+00> : vector<32x2xf32>
    %9 = tpu.matmul %8, %7, %cst_8 {dimension_numbers = #tpu.dot_dimension_numbers<[1], [0], [0], [1], [0, 0, 1, 1], [], []>} : vector<32x32xf32>, vector<32x2xf32>, vector<32x2xf32> -> vector<32x2xf32>
    %c0_9 = arith.constant 0 : index
    %c0_10 = arith.constant 0 : index
    %10 = vector.load %arg5[%c0_9, %c0_10] : memref<32x1xf32, #tpu.memory_space<vmem>>, vector<32x1xf32>
    %11 = vector.broadcast %10 : vector<32x1xf32> to vector<32x2xf32>
    %12 = arith.addf %9, %11 : vector<32x2xf32>
    %cst_11 = arith.constant 0.000000e+00 : f32
    %13 = vector.broadcast %cst_11 : f32 to vector<32x2xf32>
    %14 = arith.maximumf %12, %13 : vector<32x2xf32>
    %c0_12 = arith.constant 0 : index
    %c0_13 = arith.constant 0 : index
    %15 = vector.load %arg6[%c0_12, %c0_13] : memref<4x32xf32, #tpu.memory_space<vmem>>, vector<4x32xf32>
    %cst_14 = arith.constant dense<0.000000e+00> : vector<4x2xf32>
    %16 = tpu.matmul %15, %14, %cst_14 {dimension_numbers = #tpu.dot_dimension_numbers<[1], [0], [0], [1], [0, 0, 1, 1], [], []>} : vector<4x32xf32>, vector<32x2xf32>, vector<4x2xf32> -> vector<4x2xf32>
    %c0_15 = arith.constant 0 : index
    %c0_16 = arith.constant 0 : index
    %17 = vector.load %arg7[%c0_15, %c0_16] : memref<4x1xf32, #tpu.memory_space<vmem>>, vector<4x1xf32>
    %18 = vector.broadcast %17 : vector<4x1xf32> to vector<4x2xf32>
    %19 = arith.addf %16, %18 : vector<4x2xf32>
    %20 = math.tanh %19 : vector<4x2xf32>
    %c0_17 = arith.constant 0 : index
    %c0_18 = arith.constant 0 : index
    %21 = vector.load %arg8[%c0_17, %c0_18] : memref<4x1xf32, #tpu.memory_space<vmem>>, vector<4x1xf32>
    %22 = vector.broadcast %21 : vector<4x1xf32> to vector<4x2xf32>
    %23 = arith.mulf %20, %22 : vector<4x2xf32>
    %c0_19 = arith.constant 0 : index
    %c0_20 = arith.constant 0 : index
    %24 = vector.load %arg9[%c0_19, %c0_20] : memref<4x1xf32, #tpu.memory_space<vmem>>, vector<4x1xf32>
    %25 = vector.broadcast %24 : vector<4x1xf32> to vector<4x2xf32>
    %26 = arith.addf %23, %25 : vector<4x2xf32>
    %c0_21 = arith.constant 0 : index
    %c0_22 = arith.constant 0 : index
    %27 = vector.load %arg10[%c0_21, %c0_22] : memref<4x2xf32, #tpu.memory_space<vmem>>, vector<4x2xf32>
    tpu.vector_store %arg10[%c0_21, %c0_22], %26 {strides = array<i32>} : memref<4x2xf32, #tpu.memory_space<vmem>>, vector<4x2xf32>,
    return
  }
  func.func @transform_0(%arg0: i32) -> (i32, i32) {
    %c0_i32 = arith.constant 0 : i32
    %c0_i32_0 = arith.constant 0 : i32
    return %c0_i32, %arg0 : i32, i32
  }
  func.func @transform_1(%arg0: i32) -> (i32, i32) {
    %c0_i32 = arith.constant 0 : i32
    %c0_i32_0 = arith.constant 0 : i32
    %c0_i32_1 = arith.constant 0 : i32
    return %c0_i32, %c0_i32_0 : i32, i32
  }
  func.func @transform_2(%arg0: i32) -> (i32, i32) {
    %c0_i32 = arith.constant 0 : i32
    %c0_i32_0 = arith.constant 0 : i32
    %c0_i32_1 = arith.constant 0 : i32
    return %c0_i32, %c0_i32_0 : i32, i32
  }
  func.func @transform_3(%arg0: i32) -> (i32, i32) {
    %c0_i32 = arith.constant 0 : i32
    %c0_i32_0 = arith.constant 0 : i32
    %c0_i32_1 = arith.constant 0 : i32
    return %c0_i32, %c0_i32_0 : i32, i32
  }
  func.func @transform_4(%arg0: i32) -> (i32, i32) {
    %c0_i32 = arith.constant 0 : i32
    %c0_i32_0 = arith.constant 0 : i32
    %c0_i32_1 = arith.constant 0 : i32
    return %c0_i32, %c0_i32_0 : i32, i32
  }
  func.func @transform_5(%arg0: i32) -> (i32, i32) {
    %c0_i32 = arith.constant 0 : i32
    %c0_i32_0 = arith.constant 0 : i32
    %c0_i32_1 = arith.constant 0 : i32
    return %c0_i32, %c0_i32_0 : i32, i32
  }
  func.func @transform_6(%arg0: i32) -> (i32, i32) {
    %c0_i32 = arith.constant 0 : i32
    %c0_i32_0 = arith.constant 0 : i32
    %c0_i32_1 = arith.constant 0 : i32
    return %c0_i32, %c0_i32_0 : i32, i32
  }
  func.func @transform_7(%arg0: i32) -> (i32, i32) {
    %c0_i32 = arith.constant 0 : i32
    %c0_i32_0 = arith.constant 0 : i32
    %c0_i32_1 = arith.constant 0 : i32
    return %c0_i32, %c0_i32_0 : i32, i32
  }
  func.func @transform_8(%arg0: i32) -> (i32, i32) {
    %c0_i32 = arith.constant 0 : i32
    %c0_i32_0 = arith.constant 0 : i32
    %c0_i32_1 = arith.constant 0 : i32
    return %c0_i32, %c0_i32_0 : i32, i32
  }
  func.func @transform_9(%arg0: i32) -> (i32, i32) {
    %c0_i32 = arith.constant 0 : i32
    %c0_i32_0 = arith.constant 0 : i32
    return %c0_i32, %arg0 : i32, i32
  }
}

</mosaic_0001>

<bundles_post_ra>
// kernel: tpu_custom_call.1
= control target key start
LH: loop header
LB: loop body
LE: loop exit
PB: predicated region body
PF: predicated region fallthrough
CT: control target
= control target key end

     0   :  { %vm61_vm0 = vcmask 64512   ;;  %v476_v3 = vmov 0   ;;  %vm191_vm1 = vcmask 261120   ;;  %v477_v39 = vmov 0.0|0.0   ;;  %s605_s0 = inlined_call_operand.vmem [shape: f32[8,2], index: 0, kind: input, shape index: {}]   ;;  %s606_s1 = inlined_call_operand.vmem [shape: f32[32,8], index: 1, kind: input, shape index: {}]   ;;  %s607_s2 = inlined_call_operand.vmem [shape: f32[32,1], index: 2, kind: input, shape index: {}]   ;;  %s608_s4 = inlined_call_operand.vmem [shape: f32[32,1], index: 4, kind: input, shape index: {}]   ;;  %s609_s6 = inlined_call_operand.vmem [shape: f32[4,1], index: 6, kind: input, shape index: {}]   ;;  %s610_s7 = inlined_call_operand.vmem [shape: f32[4,1], index: 7, kind: input, shape index: {}]   ;;  %s611_s8 = inlined_call_operand.vmem [shape: f32[4,1], index: 8, kind: input, shape index: {}]   ;;  %s612_s3 = inlined_call_operand.vmem [shape: f32[32,32], index: 3, kind: input, shape index: {}]   ;;  %s613_s5 = inlined_call_operand.vmem [shape: f32[4,32], index: 5, kind: input, shape index: {}]   ;;  %s614_s9 = inlined_call_operand.vmem [shape: f32[4,2], index: 9, kind: output, shape index: {}]  }
   0x1   :  { %v32_v0 = vld [vmem:[%s605_s0] sm:$0xff]  ;;  %v34_v2 = vld [vmem:[%s606_s1 + $0x8] sm:$0xff]  ;;  %472 = vset.pattern.permute.xlu0 %v476_v3  ;;  %473 = vset.pattern.permute.xlu1 %v476_v3  ;;  %v35_v4 = vld [vmem:[%s606_s1 + $0x10] sm:$0xff]  ;;  %vm478_vm2 = vmmov 0   ;;  %v479_v40 = vmov 0.0   ;;  %vm388_vm3 = vcmask 11264  }
   0x2   :  { %v33_v1 = vld [vmem:[%s606_s1] sm:$0xff]  ;;  %421 = vmatprep.subr.mxu0 %v32_v0  ;;  %v39_v6 = vld [vmem:[%s607_s2 + $0x10] sm:$0xff]  ;;  %v38_v7 = vld [vmem:[%s607_s2 + $0x8] sm:$0xff] }
   0x3   :  { %423 = vmatprep.mubr.msk.f32.mxu0 %vm61_vm0, %v33_v1  ;;  %v37_v5 = vld [vmem:[%s607_s2] sm:$0xff]  ;;  %422 = vmatpush3.msra.mxu0 %v32_v0  ;;  %v36_v8 = vld [vmem:[%s606_s1 + $0x18] sm:$0xff]  ;;  %v168_v11 = vld [vmem:[%s608_s4 + $0x8] sm:$0xff] }
   0x4   :  { %43 = vperm.xlu0 %472, %v37_v5   ;;  %424 = vmatmul.mubr.msk.f32.vlgmr.msra.gmra.mrb[0].mxu0 %vm61_vm0, %v34_v2  ;;  %v40_v9 = vld [vmem:[%s607_s2 + $0x18] sm:$0xff]  ;;  %v167_v10 = vld [vmem:[%s608_s4] sm:$0xff]  ;;  %v169_v12 = vld [vmem:[%s608_s4 + $0x10] sm:$0xff] }
   0x5   :  { %53 = vperm.xlu1 %473, %v39_v6   ;;  %426 = vmatprep.mubr.msk.f32.mxu0 %vm61_vm0, %v35_v4  ;;  %v170_v13 = vld [vmem:[%s608_s4 + $0x18] sm:$0xff]  ;;  %v294_v14 = vld [vmem:[%s609_s6] sm:$0xf]  ;;  %v164_v36 = vld [vmem:[%s612_s3 + $0x8] sm:$0xff] }
   0x6   :  { %v374_v15 = vld [vmem:[%s610_s7] sm:$0xf]  ;;  %v165_v37 = vld [vmem:[%s612_s3 + $0x10] sm:$0xff]  ;;  %v166_v38 = vld [vmem:[%s612_s3 + $0x18] sm:$0xff]  ;;  %462 = vmatprep.subr.bf16.mxu0 %v477_v39 }
   0x7   :  { %v381_v16 = vld [vmem:[%s611_s8] sm:$0xf] }
   0x8   :  { %48 = vperm.xlu0 %472, %v38_v7   ;;  %427 = vmatmul.mubr.msk.f32.gmra.mrb[2].mxu0 %vm61_vm0, %v36_v8  ;;  %v163_v17 = vld [vmem:[%s612_s3] sm:$0xff] }
   0x9   :  { %58 = vperm.xlu1 %473, %v40_v9   ;;  %437 = vmatprep.mubr.msk.f32.mxu1 %vm191_vm1, %v163_v17  ;;  %v293_v59 = vld [vmem:[%s613_s5] sm:$0xf] }
   0xa   :  { %451 = vmatprep.mubr.msk.f32.mxu0 %vm478_vm2, %v479_v40 }
   0xc   :  { %173 = vperm.xlu0 %472, %v167_v10  }
   0xd   :  { %178 = vperm.xlu1 %473, %v168_v11  }
  0x10   :  { %183 = vperm.xlu0 %472, %v169_v12  }
  0x11   :  { %188 = vperm.xlu1 %473, %v170_v13  }
  0x14   :  { %297 = vperm.xlu0 %472, %v294_v14  }
  0x15   :  { %377 = vperm.xlu1 %473, %v374_v15  }
  0x18   :  { %384 = vperm.xlu0 %472, %v381_v16  }
  0x83   :  { %v44_v18 = vpop.permute.xlu0 %43 }
  0x84   :  { %v54_v19 = vpop.permute.xlu1 %53 }
  0x87   :  { %v49_v20 = vpop.permute.xlu0 %48 }
  0x88   :  { %v59_v26 = vpop.permute.xlu1 %58 }
  0x8b   :  { %v174_v42 = vpop.permute.xlu0 %173 }
  0x8c   :  { %v179_v41 = vpop.permute.xlu1 %178 }
  0x8f   :  { %v184_v51 = vpop.permute.xlu0 %183 }
  0x90   :  { %v189_v48 = vpop.permute.xlu1 %188 }
  0x93   :  { %v298_v60 = vpop.permute.xlu0 %297 }
  0x94   :  { %v378_v1 = vpop.permute.xlu1 %377 }
  0x97   :  { %v385_v3 = vpop.permute.xlu0 %384 }
  0xd7   :  { %v425_v21 = vpop.f32.mrb[0].mxu0 }
  0xd8   :  { %v146_v22 = vadd.f32 %v425_v21, %v49_v20  ;;  %v140_v23 = vpop.f32.mrb[1].mxu0 }
  0xd9   :  { %v141_v24 = vadd.f32 %v140_v23, %v44_v18 }
  0xda   :  { %v160_v25 = vmax.f32 %v146_v22, 0.0 }
  0xdb   :  { %v159_v27 = vmax.f32 %v141_v24, 0.0  ;;  %v428_v28 = vpop.f32.mrb[2].mxu0 }
  0xdc   :  { %v156_v29 = vadd.f32 %v428_v28, %v59_v26  ;;  %v150_v30 = vpop.f32.mrb[3].mxu0 }
  0xdd   :  { %v151_v31 = vadd.f32 %v150_v30, %v54_v19  ;;  %v454_v32 = vpack.c.bf16 %v160_v25, %v159_v27 }
  0xde   :  { %v162_v33 = vmax.f32 %v156_v29, 0.0 }
  0xdf   :  { %v161_v34 = vmax.f32 %v151_v31, 0.0  ;;  %455 = vmatprep.subr.bf16.mxu1 %v454_v32 }
  0xe0   :  { %457 = vmatpush3.bf16.msra.mxu1 %v454_v32 }
  0xe1   :  { %v458_v35 = vpack.c.bf16 %v162_v33, %v161_v34 }
  0xe3   :  { %459 = vmatprep.subr.bf16.mxu1 %v458_v35 }
  0xe4   :  { %461 = vmatpush3.bf16.msra.mxu1 %v458_v35 }
  0xe7   :  { %438 = vmatmul.mubr.msk.f32.vlgmr.msra.gmra.mrb[0].mxu1 %vm191_vm1, %v164_v36 }
  0xe8   :  { %440 = vmatprep.mubr.msk.f32.mxu1 %vm191_vm1, %v165_v37 }
  0xeb   :  { %441 = vmatmul.mubr.msk.f32.gmra.mrb[2].mxu1 %vm191_vm1, %v166_v38 }
 0x1ba   :  { %v439_v43 = vpop.f32.mrb[0].mxu1 }
 0x1bb   :  { %v276_v44 = vadd.f32 %v439_v43, %v179_v41  ;;  %v270_v45 = vpop.f32.mrb[1].mxu1 }
 0x1bc   :  { %v271_v46 = vadd.f32 %v270_v45, %v174_v42 }
 0x1bd   :  { %v290_v47 = vmax.f32 %v276_v44, 0.0 }
 0x1be   :  { %v289_v49 = vmax.f32 %v271_v46, 0.0  ;;  %v442_v50 = vpop.f32.mrb[2].mxu1 }
 0x1bf   :  { %v286_v52 = vadd.f32 %v442_v50, %v189_v48  ;;  %v280_v53 = vpop.f32.mrb[3].mxu1 }
 0x1c0   :  { %v463_v54 = vpack.c.bf16 %v290_v47, %v289_v49  ;;  %v281_v55 = vadd.f32 %v280_v53, %v184_v51 }
 0x1c1   :  { %v292_v56 = vmax.f32 %v286_v52, 0.0 }
 0x1c2   :  { %v291_v57 = vmax.f32 %v281_v55, 0.0  ;;  %464 = vmatpush3.bf16.msra.mxu0 %v463_v54 }
 0x1c3   :  { %465 = vmatprep.subr.bf16.mxu0 %v477_v39 }
 0x1c4   :  { %v466_v58 = vpack.c.bf16 %v292_v56, %v291_v57 }
 0x1c6   :  { %467 = vmatpush3.bf16.msra.mxu0 %v466_v58 }
 0x1c9   :  { %452 = vmatmul.mubr.msk.f32.vlgmr.msra.gmra.mrb[4].mxu0 %vm191_vm1, %v293_v59 }
 0x29c   :  { %v369_v61 = vpop.f32.mrb[4].mxu0 }
 0x29d   :  { %v370_v62 = vadd.f32 %v369_v61, %v298_v60  ;;  %v453_v63 = vpop.f32.mrb[5].mxu0 }
 0x29f   :  { %474 = vtanh.f32 %v370_v62 }
 0x2a9   :  { %v475_v0 = vpop.eup %474 }
 0x2aa   :  { %v380_v2 = vmul.f32 %v475_v0, %v378_v1 }
 0x2ac   :  { %v387_v4 = vadd.f32 %v385_v3, %v380_v2 }
 0x2ae   :  { %389 = vst.msk [vmem:[%s614_s9] sm:$0xf] %vm388_vm3, %v387_v4 }

</bundles_post_ra>
